<compile_context>
chip_gen: v6e
topology: v6e:2x2x1
jax: 0.10.0
libtpu: 0.0.40
codegen_flags: <defaults>
</compile_context>

<pallas_src>
import jax
import jax.numpy as jnp
from jax.experimental import pallas as pl
from jax.experimental.pallas import tpu as pltpu


# --------------------------------------------------------------------------
# Fused Pallas kernel: y = leaky_relu(leaky_relu(x @ W1 + b1) @ W2 + b2)
# --------------------------------------------------------------------------
def _simple_decoder_kernel(x_ref, w1_ref, b1_ref, w2_ref, b2_ref, o_ref, *, slope):
    x = x_ref[...].astype(jnp.float32)                       # (tm, 8)
    w1 = w1_ref[...].astype(jnp.float32)                     # (8, 16)
    w2 = w2_ref[...].astype(jnp.float32)                     # (16, N)

    h = jnp.dot(x, w1, preferred_element_type=jnp.float32) + b1_ref[...]
    h = jnp.where(h > 0, h, slope * h)                       # LeakyReLU(0.2)

    y = jnp.dot(h, w2, preferred_element_type=jnp.float32) + b2_ref[...]
    y = jnp.where(y > 0, y, slope * y)                       # LeakyReLU(0.2)

    o_ref[...] = y.astype(o_ref.dtype)


def _pick_row_tile(M):
    """Row tile: full array if not 8-divisible, else an 8-aligned divisor <= 256."""
    if M % 8 != 0:
        return M
    tm = min(M, 256)
    while M % tm != 0:
        tm -= 8
    return tm


def simple_decoder_forward(x, params, *, slope=0.2):
    """x: (..., 8) -> (..., input_size). Single fused pallas_call."""
    orig_shape = x.shape
    K = orig_shape[-1]
    x2d = x.reshape(-1, K)
    M = x2d.shape[0]

    w1, b1 = params["w1"], params["b1"]          # (8, 16), (1, 16)
    w2, b2 = params["w2"], params["b2"]          # (16, N), (1, N)
    H = w1.shape[1]
    N = w2.shape[1]

    tm = _pick_row_tile(M)
    grid = (M // tm,)

    from functools import partial
    out = pl.pallas_call(
        partial(_simple_decoder_kernel, slope=slope),
        out_shape=jax.ShapeDtypeStruct((M, N), x.dtype),
        grid=grid,
        in_specs=[
            pl.BlockSpec((tm, K), lambda i: (i, 0)),
            pl.BlockSpec((K, H), lambda i: (0, 0)),
            pl.BlockSpec((1, H), lambda i: (0, 0)),
            pl.BlockSpec((H, N), lambda i: (0, 0)),
            pl.BlockSpec((1, N), lambda i: (0, 0)),
        ],
        out_specs=pl.BlockSpec((tm, N), lambda i: (i, 0)),
        compiler_params=pltpu.CompilerParams(
            dimension_semantics=("parallel",)),     # shards row tiles across v7x's 2 TCs
    )(x2d, w1, b1, w2, b2)

    return out.reshape(orig_shape[:-1] + (N,))


# --------------------------------------------------------------------------
# Deterministic parameter init (weights pre-transposed to (K, N) once, at init)
# --------------------------------------------------------------------------
def init_params(key, input_size):
    k1, k2, k3, k4 = jax.random.split(key, 4)
    # PyTorch nn.Linear default: U(-1/sqrt(fan_in), 1/sqrt(fan_in))
    lim1 = 1.0 / jnp.sqrt(8.0)
    lim2 = 1.0 / jnp.sqrt(16.0)
    return {
        # stored as (in_features, out_features) == (K, N): no .T in forward
        "w1": jax.random.uniform(k1, (8, 16), jnp.float32, -lim1, lim1),
        "b1": jax.random.uniform(k2, (1, 16), jnp.float32, -lim1, lim1),
        "w2": jax.random.uniform(k3, (16, input_size), jnp.float32, -lim2, lim2),
        "b2": jax.random.uniform(k4, (1, input_size), jnp.float32, -lim2, lim2),
    }


# --------------------------------------------------------------------------
# Pure-JAX reference (for correctness check only)
# --------------------------------------------------------------------------
def _reference_forward(x, params, slope=0.2):
    h = x @ params["w1"] + params["b1"]
    h = jnp.where(h > 0, h, slope * h)
    y = h @ params["w2"] + params["b2"]
    y = jnp.where(y > 0, y, slope * y)
    return y


# --------------------------------------------------------------------------
if __name__ == "__main__":
    input_size = 32          # output feature size of fc2
    batch = 16               # small batch; input feature dim fixed at 8 by fc1

    key = jax.random.PRNGKey(0)
    k_param, k_x = jax.random.split(key)

    params = init_params(k_param, input_size)
    x = jax.random.normal(k_x, (batch, 8), jnp.float32)

    out = simple_decoder_forward(x, params)
    out = jax.block_until_ready(out)

    assert out.shape == (batch, input_size)
    assert jnp.all(jnp.isfinite(out))

    ref = _reference_forward(x, params)
    assert jnp.allclose(out, ref, atol=1e-5, rtol=1e-5), "mismatch vs pure-JAX reference"

    print("KERNEL_OK")
</pallas_src>

<mosaic_0001>
module attributes {stable_mosaic.version = 11 : i64} {
  func.func @_simple_decoder_kernel(%arg0: i32, %arg1: memref<16x8xf32, #tpu.memory_space<vmem>>, %arg2: memref<8x16xf32, #tpu.memory_space<vmem>>, %arg3: memref<1x16xf32, #tpu.memory_space<vmem>>, %arg4: memref<16x32xf32, #tpu.memory_space<vmem>>, %arg5: memref<1x32xf32, #tpu.memory_space<vmem>>, %arg6: memref<16x32xf32, #tpu.memory_space<vmem>>) attributes {dimension_semantics = [#tpu.dimension_semantics<parallel>], iteration_bounds = array<i64: 1>, scalar_prefetch = 0 : i64, scratch_operands = 0 : i64, tpu.core_type = #tpu.core_type<tc>, window_params = [{transform_indices = @transform_0, window_bounds = array<i64: 16, 8>}, {pipeline_mode = #tpu.pipeline_mode<synchronous>, transform_indices = @transform_1, window_bounds = array<i64: 8, 16>}, {pipeline_mode = #tpu.pipeline_mode<synchronous>, transform_indices = @transform_2, window_bounds = array<i64: 1, 16>}, {pipeline_mode = #tpu.pipeline_mode<synchronous>, transform_indices = @transform_3, window_bounds = array<i64: 16, 32>}, {pipeline_mode = #tpu.pipeline_mode<synchronous>, transform_indices = @transform_4, window_bounds = array<i64: 1, 32>}, {transform_indices = @transform_5, window_bounds = array<i64: 16, 32>}]} {
    %c0 = arith.constant 0 : index
    %c0_0 = arith.constant 0 : index
    %0 = vector.load %arg1[%c0, %c0_0] : memref<16x8xf32, #tpu.memory_space<vmem>>, vector<16x8xf32>
    %c0_1 = arith.constant 0 : index
    %c0_2 = arith.constant 0 : index
    %1 = vector.load %arg2[%c0_1, %c0_2] : memref<8x16xf32, #tpu.memory_space<vmem>>, vector<8x16xf32>
    %c0_3 = arith.constant 0 : index
    %c0_4 = arith.constant 0 : index
    %2 = vector.load %arg4[%c0_3, %c0_4] : memref<16x32xf32, #tpu.memory_space<vmem>>, vector<16x32xf32>
    %cst = arith.constant dense<0.000000e+00> : vector<16x16xf32>
    %3 = tpu.matmul %0, %1, %cst {dimension_numbers = #tpu.dot_dimension_numbers<[1], [0], [0], [1], [0, 0, 1, 1], [], []>} : vector<16x8xf32>, vector<8x16xf32>, vector<16x16xf32> -> vector<16x16xf32>
    %c0_5 = arith.constant 0 : index
    %c0_6 = arith.constant 0 : index
    %4 = vector.load %arg3[%c0_5, %c0_6] : memref<1x16xf32, #tpu.memory_space<vmem>>, vector<1x16xf32>
    %5 = vector.broadcast %4 : vector<1x16xf32> to vector<16x16xf32>
    %6 = arith.addf %3, %5 : vector<16x16xf32>
    %cst_7 = arith.constant 0.000000e+00 : f32
    %7 = vector.broadcast %cst_7 : f32 to vector<16x16xf32>
    %8 = arith.cmpf ogt, %6, %7 : vector<16x16xf32>
    %cst_8 = arith.constant 2.000000e-01 : f32
    %9 = vector.broadcast %cst_8 : f32 to vector<16x16xf32>
    %10 = arith.mulf %9, %6 : vector<16x16xf32>
    %11 = arith.select %8, %6, %10 : vector<16x16xi1>, vector<16x16xf32>
    %cst_9 = arith.constant dense<0.000000e+00> : vector<16x32xf32>
    %12 = tpu.matmul %11, %2, %cst_9 {dimension_numbers = #tpu.dot_dimension_numbers<[1], [0], [0], [1], [0, 0, 1, 1], [], []>} : vector<16x16xf32>, vector<16x32xf32>, vector<16x32xf32> -> vector<16x32xf32>
    %c0_10 = arith.constant 0 : index
    %c0_11 = arith.constant 0 : index
    %13 = vector.load %arg5[%c0_10, %c0_11] : memref<1x32xf32, #tpu.memory_space<vmem>>, vector<1x32xf32>
    %14 = vector.broadcast %13 : vector<1x32xf32> to vector<16x32xf32>
    %15 = arith.addf %12, %14 : vector<16x32xf32>
    %cst_12 = arith.constant 0.000000e+00 : f32
    %16 = vector.broadcast %cst_12 : f32 to vector<16x32xf32>
    %17 = arith.cmpf ogt, %15, %16 : vector<16x32xf32>
    %cst_13 = arith.constant 2.000000e-01 : f32
    %18 = vector.broadcast %cst_13 : f32 to vector<16x32xf32>
    %19 = arith.mulf %18, %15 : vector<16x32xf32>
    %20 = arith.select %17, %15, %19 : vector<16x32xi1>, vector<16x32xf32>
    %c0_14 = arith.constant 0 : index
    %c0_15 = arith.constant 0 : index
    %21 = vector.load %arg6[%c0_14, %c0_15] : memref<16x32xf32, #tpu.memory_space<vmem>>, vector<16x32xf32>
    tpu.vector_store %arg6[%c0_14, %c0_15], %20 {strides = array<i32>} : memref<16x32xf32, #tpu.memory_space<vmem>>, vector<16x32xf32>,
    return
  }
  func.func @transform_0(%arg0: i32) -> (i32, i32) {
    %c0_i32 = arith.constant 0 : i32
    %c0_i32_0 = arith.constant 0 : i32
    return %arg0, %c0_i32 : i32, i32
  }
  func.func @transform_1(%arg0: i32) -> (i32, i32) {
    %c0_i32 = arith.constant 0 : i32
    %c0_i32_0 = arith.constant 0 : i32
    %c0_i32_1 = arith.constant 0 : i32
    return %c0_i32, %c0_i32_0 : i32, i32
  }
  func.func @transform_2(%arg0: i32) -> (i32, i32) {
    %c0_i32 = arith.constant 0 : i32
    %c0_i32_0 = arith.constant 0 : i32
    %c0_i32_1 = arith.constant 0 : i32
    return %c0_i32, %c0_i32_0 : i32, i32
  }
  func.func @transform_3(%arg0: i32) -> (i32, i32) {
    %c0_i32 = arith.constant 0 : i32
    %c0_i32_0 = arith.constant 0 : i32
    %c0_i32_1 = arith.constant 0 : i32
    return %c0_i32, %c0_i32_0 : i32, i32
  }
  func.func @transform_4(%arg0: i32) -> (i32, i32) {
    %c0_i32 = arith.constant 0 : i32
    %c0_i32_0 = arith.constant 0 : i32
    %c0_i32_1 = arith.constant 0 : i32
    return %c0_i32, %c0_i32_0 : i32, i32
  }
  func.func @transform_5(%arg0: i32) -> (i32, i32) {
    %c0_i32 = arith.constant 0 : i32
    %c0_i32_0 = arith.constant 0 : i32
    return %arg0, %c0_i32 : i32, i32
  }
}

</mosaic_0001>

<bundles_post_ra>
// kernel: tpu_custom_call.1
= control target key start
LH: loop header
LB: loop body
LE: loop exit
PB: predicated region body
PF: predicated region fallthrough
CT: control target
= control target key end

     0   :  { %vm33_vm0 = vcmask 64512   ;;  %s342_s0 = inlined_call_operand.vmem [shape: f32[16,8], index: 0, kind: input, shape index: {}]   ;;  %s343_s1 = inlined_call_operand.vmem [shape: f32[8,16], index: 1, kind: input, shape index: {}]   ;;  %s344_s2 = inlined_call_operand.vmem [shape: f32[1,16], index: 2, kind: input, shape index: {}]   ;;  %s345_s3 = inlined_call_operand.vmem [shape: f32[16,32], index: 3, kind: input, shape index: {}]   ;;  %s346_s4 = inlined_call_operand.vmem [shape: f32[1,32], index: 4, kind: input, shape index: {}]   ;;  %s347_s5 = inlined_call_operand.hbm [shape: f32[16,32], index: 5, kind: output, shape index: {}]  }
   0x1   :  { %v23_v0 = vld [vmem:[%s343_s1] sm:$0xff]  ;;  %v22_v2 = vld [vmem:[%s342_s0 + $0x8] sm:$0xff] }
   0x2   :  { %v21_v1 = vld [vmem:[%s342_s0] sm:$0xff]  ;;  %248 = vmatprep.subr.mxu0 %v23_v0 }
   0x3   :  { %250 = vmatprep.mubr.msk.f32.mxu0 %vm33_vm0, %v21_v1 }
   0x4   :  { %10 = vsyncpa [#allocation3], 0  ;;  %249 = vmatpush3.msra.mxu0 %v23_v0  ;;  %v25_v3 = vld [vmem:[%s345_s3 + $0x8] sm:$0xff]  ;;  %v24_v4 = vld [vmem:[%s345_s3] sm:$0xff]  ;;  %vm128_vm3 = vcmask 130048   ;;  %vm216_vm5 = vcmask 261120  }
   0x5   :  { %251 = vmatmul.mubr.msk.f32.vlgmr.msra.gmra.mxu0 %vm33_vm0, %v22_v2  ;;  %253 = vmatprep.subr.mxu1 %v25_v3  ;;  %v235_v5 = vld [vmem:[%s344_s2] ss:$0 sm:$0xff]  ;;  %s285_s2 = smov [#allocation2]  }
   0x6   :  { %254 = vmatpush3.msra.mxu1 %v25_v3  ;;  %v238_v14 = vld [vmem:[%s346_s4] ss:$0 sm:$0xff]  ;;  %s224_s29 = sshll.u32 %s285_s2, 4  ;;  %s225_s29 = int_to_ptr.vmem [resolvable:$true] %s224_s29 }
   0x7   :  { %255 = vmatprep.subr.mxu1 %v24_v4  ;;  %s263_s30 = scalar_lea.vmem %s225_s29, 256  ;;  %p268_p1 = scmp.lt.s32.totalorder %s225_s29, %s225_s29 }
   0x8   :  { %256 = vmatpush3.msra.mxu1 %v24_v4  ;;  %p264_p0 = scmp.ne.s32.totalorder %s225_s29, %s263_s30  ;;  %p269_p2 = scmp.lt.s32.totalorder %s263_s30, %s263_s30 }
   0xa   :  { %p270_p3 = por %p269_p2, %p268_p1 }
   0xc   :  { %p271_p4 = pnand %p270_p3, %p264_p0 }
  0xc5   :  { %v252_v6 = vpop.f32.mrf.mxu0 }
  0xc6   :  { %v112_v7 = vadd.f32 %v252_v6, %v235_v5 }
  0xc7   :  { %v106_v8 = vpop.f32.mrf.mxu0 }
  0xc8   :  { %v107_v9 = vadd.f32 %v235_v5, %v106_v8  ;;  %v118_v10 = vmul.f32 0.2, %v112_v7  ;;  %vm116_vm1 = vcmp.gt.f32.partialorder %v112_v7, 0.0 }
  0xca   :  { %vm115_vm2 = vcmp.gt.f32.partialorder %v107_v9, 0.0  ;;  %v117_v11 = vmul.f32 0.2, %v107_v9  ;;  %v120_v13 = vsel %vm116_vm1, %v112_v7, %v118_v10 }
  0xcc   :  { %v119_v12 = vsel %vm115_vm2, %v107_v9, %v117_v11 }
  0xcd   :  { %257 = vmatprep.mubr.msk.f32.mxu1 %vm128_vm3, %v119_v12 }
  0xce   :  { %258 = vmatmul.mubr.msk.f32.vlgmr.msra.gmra.mxu1 %vm128_vm3, %v120_v13 }
 0x18e   :  { %v259_v15 = vpop.f32.mrf.mxu1 }
 0x18f   :  { %v207_v16 = vadd.f32 %v259_v15, %v238_v14 }
 0x190   :  { %v201_v17 = vpop.f32.mrf.mxu1 }
 0x191   :  { %vm211_vm4 = vcmp.gt.f32.partialorder %v207_v16, 0.0  ;;  %v213_v18 = vmul.f32 0.2, %v207_v16  ;;  %v202_v19 = vadd.f32 %v238_v14, %v201_v17 }
 0x193   :  { %v215_v20 = vsel %vm211_vm4, %v207_v16, %v213_v18  ;;  %vm210_vm6 = vcmp.gt.f32.partialorder %v202_v19, 0.0  ;;  %v212_v21 = vmul.f32 0.2, %v202_v19 }
 0x194   :  { %218 = vst.msk [vmem:[#allocation2 + $0x8] sm:$0xff] %vm216_vm5, %v215_v20 }
 0x195   :  { %v214_v22 = vsel %vm210_vm6, %v202_v19, %v212_v21 }
 0x196   :  { %217 = vst.msk [vmem:[#allocation2] sm:$0xff] %vm216_vm5, %v214_v22 }
 0x197   :  { %274 = shalt.err (!%p271_p4)
}
 0x198   :  { %s286_s4 = smov 128   ;;  %s287_s6 = smov 8  }
 0x199   :  { %230 = dma.vmem_to_hbm [thread:$0]  %s225_s29, 256, %s347_s5, [#allocation3], %s286_s4, %s286_s4, %s287_s6  }
 0x19a   :  { %283 = dma.done.wait [#allocation3], 256  }
 0x19b   :  { %284 = vsyncadd [#allocation3], 4294967040 }
 0x19c   :  { %234 = vsyncpa [#allocation3], 1 }

</bundles_post_ra>
